<compile_context>
chip_gen: v5e
topology: v5e:2x2
jax: 0.10.0
libtpu: 0.0.40
codegen_flags: <defaults>
</compile_context>

<pallas_src>
import functools

import jax
import jax.numpy as jnp
from jax.experimental import pallas as pl
from jax.experimental.pallas import tpu as pltpu


# ---------------------------------------------------------------------------
# Kernel
# ---------------------------------------------------------------------------
def _pool_head_kernel(x_ref, w_ref, b_ref, o_ref, acc_ref, *,
                      inv_hw, acc_lanes, groups, is_max):
    """One (batch_tile, spatial_chunk) grid step.

    x_ref:   (tile_n, C, hw_chunk)   streamed input block (native dtype)
    w_ref:   (C, F)                  VMEM-resident weight (native dtype)
    b_ref:   (1, F)                  VMEM-resident bias
    o_ref:   (tile_n, F)             output block (written on last spatial step)
    acc_ref: (tile_n, C, acc_lanes)  f32 running partial sums / maxes
    """
    s = pl.program_id(1)  # spatial (reduction) step

    @pl.when(s == 0)
    def _init():
        if is_max:
            acc_ref[...] = jnp.full(acc_ref.shape, -jnp.inf, acc_ref.dtype)
        else:
            acc_ref[...] = jnp.zeros(acc_ref.shape, acc_ref.dtype)

    # Hot loop: fold this chunk's 128-lane groups together with plain VPU
    # adds/maxes (widened to f32).  No per-vreg XLU lane reduce here.
    part = x_ref[:, :, 0:acc_lanes].astype(jnp.float32)
    for g in range(1, groups):
        nxt = x_ref[:, :, g * acc_lanes:(g + 1) * acc_lanes].astype(jnp.float32)
        part = jnp.maximum(part, nxt) if is_max else part + nxt
    if is_max:
        acc_ref[...] = jnp.maximum(acc_ref[...], part)
    else:
        acc_ref[...] += part

    @pl.when(s == pl.num_programs(1) - 1)
    def _finalize():
        # Single cross-lane reduce per batch tile, then scale once (avg).
        if is_max:
            pooled = jnp.max(acc_ref[...], axis=-1)                      # (tile_n, C)
        else:
            pooled = jnp.sum(acc_ref[...], axis=-1) * jnp.float32(inv_hw)
        # Keep the (C, F) weight in its native dtype; cast the tiny pooled
        # activations instead (no CxF f32 temporary; bf16 weights keep the
        # fast single-pass MXU path).
        out = jnp.dot(pooled.astype(w_ref.dtype), w_ref[...],
                      preferred_element_type=jnp.float32)                # (tile_n, F)
        out = out + b_ref[...].astype(jnp.float32)
        o_ref[...] = out.astype(o_ref.dtype)


# ---------------------------------------------------------------------------
# Padding-aware VMEM model + tile selection
# ---------------------------------------------------------------------------
def _round_up(x, m):
    return -(-x // m) * m


def _padded_bytes(shape, itemsize):
    """VMEM footprint of a block: last dim pads to 128 lanes, second-to-last
    to the dtype's sublane tile (8 for 4B, 16 for 2B, 32 for 1B)."""
    shape = tuple(int(d) for d in shape)
    if len(shape) == 1:
        shape = (1,) + shape
    sublane = max(8, 32 // itemsize)
    lead = 1
    for d in shape[:-2]:
        lead *= d
    return lead * _round_up(shape[-2], sublane) * _round_up(shape[-1], 128) * itemsize


def _vmem_limit_bytes():
    """Explicit scoped-VMEM limit: ~75% of physical VMEM, capped at 96 MiB
    (v5e/v6e: 128 MiB -> 96 MiB; v7x: 64 MiB -> 48 MiB)."""
    cap = None
    try:
        cap = getattr(pltpu.get_tpu_info(), "vmem_capacity_bytes", None)
    except Exception:
        cap = None
    if not cap:
        cap = 64 << 20  # most restrictive current generation (v7x)
    return int(max(min(cap * 3 // 4, 96 << 20), 32 << 20))


def _choose_tiling(N, C, HW, F, x_itemsize, w_itemsize, out_itemsize, budget):
    """Jointly pick (tile_n, hw_chunk) maximizing the streamed x block under a
    padding-aware VMEM budget, preferring (a) no batch padding and (b) >= 2
    batch tiles so v7x's two TensorCores both get work."""
    # Spatial chunk candidates: last block dim must be a multiple of 128 or
    # cover the full H*W (the (8,128) layout rule).  No artificial cap.
    if HW % 128 == 0:
        hw_cands = sorted((k * 128 for k in range(1, HW // 128 + 1)
                           if HW % (k * 128) == 0), reverse=True)
    else:
        hw_cands = [HW]

    # Batch tile candidates: multiples of 8 (tile_n is the output block's
    # sublane dim) or the full batch.
    tile_cands = {N}
    t = 8
    while t < min(N, 8193):
        tile_cands.add(t)
        t += 8
    tile_cands = sorted(tile_cands, reverse=True)

    # Weight/bias are charged twice (double-buffer worst case) so the kernel
    # still fits if single-buffering (pl.Buffered(1)) is unavailable.
    fixed = 2 * (_padded_bytes((C, F), w_itemsize)
                 + _padded_bytes((1, F), w_itemsize))

    def vmem_needed(tile_n, hw_chunk):
        acc_lanes = 128 if hw_chunk % 128 == 0 else hw_chunk
        return (fixed
                + 2 * _padded_bytes((tile_n, C, hw_chunk), x_itemsize)  # x, 2-buf
                + 2 * _padded_bytes((tile_n, F), out_itemsize)          # out, 2-buf
                + _padded_bytes((tile_n, C, acc_lanes), 4))             # f32 acc

    best = None
    for hw_chunk in hw_cands:
        for tile_n in tile_cands:
            if vmem_needed(tile_n, hw_chunk) > budget:
                continue
            n_tiles = -(-N // tile_n)
            no_pad = (N % tile_n == 0)
            multi = (n_tiles >= 2) or (N == 1)
            block_bytes = _padded_bytes((tile_n, C, hw_chunk), x_itemsize)
            waste = n_tiles * tile_n - N
            key = (no_pad, multi, block_bytes, -waste, tile_n)
            if best is None or key > best[0]:
                best = (key, tile_n, hw_chunk)
    if best is None:
        # Nothing fits the requested budget; fall back to the smallest legal
        # block (vmem_limit_bytes keeps headroom above the budget).
        return min(tile_cands), min(hw_cands)
    return best[1], best[2]


# ---------------------------------------------------------------------------
# Wrapper
# ---------------------------------------------------------------------------
def pool_head_forward(x_nchw, weight, bias, *, dropout_rate=0.0,
                      pool_type="AdaptiveAvgPool2d", vmem_budget_bytes=None):
    """PoolHead forward: AdaptiveAvg/MaxPool2d(1) -> Flatten -> Linear.

    x_nchw: (N, C, H, W); weight: (F, C); bias: (F,).  Returns (N, F).
    """
    if pool_type not in ("AdaptiveAvgPool2d", "AdaptiveMaxPool2d"):
        raise ValueError(f"unsupported pool_type: {pool_type}")
    # TODO(synk): dropout is the identity in eval mode; training-mode dropout
    # is not implemented in-kernel (would use pltpu.prng_seed/prng_random_bits
    # on the pooled activations).
    del dropout_rate

    N, C, H, W = x_nchw.shape
    F = weight.shape[0]
    HW = H * W
    is_max = (pool_type == "AdaptiveMaxPool2d")

    x_itemsize = x_nchw.dtype.itemsize
    w_itemsize = weight.dtype.itemsize
    out_dtype = x_nchw.dtype
    out_itemsize = out_dtype.itemsize

    vmem_limit = _vmem_limit_bytes()
    if vmem_budget_bytes is None:
        budget = max(vmem_limit - (4 << 20), 2 << 20)
    else:
        budget = int(vmem_budget_bytes)   # test/tuning override

    tile_n, hw_chunk = _choose_tiling(N, C, HW, F, x_itemsize, w_itemsize,
                                      out_itemsize, budget)
    acc_lanes = 128 if hw_chunk % 128 == 0 else hw_chunk
    groups = hw_chunk // acc_lanes
    n_tiles = -(-N // tile_n)
    n_pad = n_tiles * tile_n

    # Free reshape (keeps HW on lanes).
    # TODO(synk): accept channel-last (N, H, W, C) producers directly (block
    # (tile_n, hw_chunk, C)) for full lane density when HW % 128 != 0; never
    # transpose NCHW inputs here, that would cost a full extra pass over x.
    x3 = x_nchw.reshape(N, C, HW)
    if n_pad != N:
        # Awkward batch sizes: pad with zero rows to a whole number of tiles
        # and slice them off the result.
        x3 = jnp.pad(x3, ((0, n_pad - N), (0, 0), (0, 0)))
    w_t = weight.T                       # (C, F)
    b2 = bias.reshape(1, F)

    cost = pl.CostEstimate(
        flops=2 * N * C * F + N * C * HW,
        transcendentals=0,
        bytes_accessed=(N * C * HW * x_itemsize
                        + C * F * w_itemsize + F * w_itemsize
                        + N * F * out_itemsize),
    )

    kernel = functools.partial(_pool_head_kernel, inv_hw=1.0 / HW,
                               acc_lanes=acc_lanes, groups=groups,
                               is_max=is_max)

    def build(single_buffer_wb):
        if single_buffer_wb:
            # Constant index_map -> no overlap needed: keep one copy in VMEM.
            w_spec = pl.BlockSpec((C, F), lambda i, s: (0, 0),
                                  pipeline_mode=pl.Buffered(buffer_count=1))
            b_spec = pl.BlockSpec((1, F), lambda i, s: (0, 0),
                                  pipeline_mode=pl.Buffered(buffer_count=1))
        else:
            w_spec = pl.BlockSpec((C, F), lambda i, s: (0, 0))
            b_spec = pl.BlockSpec((1, F), lambda i, s: (0, 0))
        return pl.pallas_call(
            kernel,
            out_shape=jax.ShapeDtypeStruct((n_pad, F), out_dtype),
            grid_spec=pltpu.PrefetchScalarGridSpec(
                num_scalar_prefetch=0,
                grid=(n_tiles, HW // hw_chunk),
                in_specs=[
                    pl.BlockSpec((tile_n, C, hw_chunk), lambda i, s: (i, 0, s)),
                    w_spec,
                    b_spec,
                ],
                out_specs=pl.BlockSpec((tile_n, F), lambda i, s: (i, 0)),
                scratch_shapes=[pltpu.VMEM((tile_n, C, acc_lanes), jnp.float32)],
            ),
            compiler_params=pltpu.CompilerParams(
                dimension_semantics=("parallel", "arbitrary"),
                vmem_limit_bytes=int(vmem_limit)),
            cost_estimate=cost,
        )

    try:
        out = build(True)(x3, w_t, b2)
    except Exception:
        # Fallback for JAX builds without per-operand pipeline_mode support.
        # The budget already charges weight/bias at 2x, so the default
        # double-buffered path still fits scoped VMEM.
        out = build(False)(x3, w_t, b2)

    return out[:N] if n_pad != N else out


# ---------------------------------------------------------------------------
# Self-test
# ---------------------------------------------------------------------------
if __name__ == "__main__":
    key = jax.random.PRNGKey(0)

    def _check(N, C, H, W, F, k, *, pool_type="AdaptiveAvgPool2d",
               vmem_budget_bytes=None):
        kx, kw = jax.random.split(k)
        x = jax.random.normal(kx, (N, C, H, W), dtype=jnp.float32)
        # _initialize_weights: weight ~ N(0, 0.01), bias = 0
        weight = 0.01 * jax.random.normal(kw, (F, C), dtype=jnp.float32)
        bias = jnp.zeros((F,), dtype=jnp.float32)

        out = jax.block_until_ready(
            pool_head_forward(x, weight, bias, pool_type=pool_type,
                              vmem_budget_bytes=vmem_budget_bytes))
        if pool_type == "AdaptiveMaxPool2d":
            pooled_ref = jnp.max(x, axis=(2, 3))
        else:
            pooled_ref = jnp.mean(x, axis=(2, 3))
        ref = pooled_ref @ weight.T + bias
        assert out.shape == (N, F), out.shape
        assert jnp.allclose(out, ref, atol=1e-5, rtol=1e-5), (
            float(jnp.max(jnp.abs(out - ref))))

    keys = jax.random.split(key, 5)
    # Small shape from the module spec: single batch tile, single spatial step.
    _check(2, 4, 16, 16, 8, keys[0])
    # Multi-step spatial reduction (tiny budget override forces hw chunking).
    _check(8, 8, 32, 32, 16, keys[1], vmem_budget_bytes=160 * 1024)
    # Two batch tiles on the "parallel" axis; HW = 64 (< 128 lanes).
    _check(16, 8, 8, 8, 16, keys[2])
    # Awkward batch (pad-to-tile path) + 7x7 feature map; small budget so the
    # picker prefers two 8-row tiles over one full-batch tile.
    _check(10, 8, 7, 7, 12, keys[3], vmem_budget_bytes=128 * 1024)
    # AdaptiveMaxPool2d variant.
    _check(2, 4, 16, 16, 8, keys[4], pool_type="AdaptiveMaxPool2d")

    print("KERNEL_OK")
</pallas_src>

<mosaic_0001>
module attributes {stable_mosaic.version = 11 : i64} {
  func.func @_pool_head_kernel(%arg0: i32, %arg1: i32, %arg2: memref<2x4x256xf32, #tpu.memory_space<vmem>>, %arg3: memref<4x8xf32, #tpu.memory_space<vmem>>, %arg4: memref<1x8xf32, #tpu.memory_space<vmem>>, %arg5: memref<2x8xf32, #tpu.memory_space<vmem>>, %arg6: memref<2x4x128xf32, #tpu.memory_space<vmem>>) attributes {dimension_semantics = [#tpu.dimension_semantics<parallel>, #tpu.dimension_semantics<arbitrary>], iteration_bounds = array<i64: 1, 1>, scalar_prefetch = 0 : i64, scratch_operands = 1 : i64, tpu.core_type = #tpu.core_type<tc>, window_params = [{transform_indices = @transform_0, window_bounds = array<i64: 2, 4, 256>}, {pipeline_mode = #tpu.pipeline_mode<synchronous>, transform_indices = @transform_1, window_bounds = array<i64: 4, 8>}, {pipeline_mode = #tpu.pipeline_mode<synchronous>, transform_indices = @transform_2, window_bounds = array<i64: 1, 8>}, {transform_indices = @transform_3, window_bounds = array<i64: 2, 8>}]} {
    %c0_i32 = arith.constant 0 : i32
    %0 = arith.cmpi eq, %arg1, %c0_i32 : i32
    %1 = arith.extui %0 : i1 to i32
    %c0_i32_0 = arith.constant 0 : i32
    %2 = arith.cmpi ne, %1, %c0_i32_0 : i32
    scf.if %2 {
      %cst = arith.constant 0.000000e+00 : f32
      %12 = vector.broadcast %cst : f32 to vector<2x4x128xf32>
      %c0_13 = arith.constant 0 : index
      %c0_14 = arith.constant 0 : index
      %c0_15 = arith.constant 0 : index
      %13 = vector.load %arg6[%c0_13, %c0_14, %c0_15] : memref<2x4x128xf32, #tpu.memory_space<vmem>>, vector<2x4x128xf32>
      tpu.vector_store %arg6[%c0_13, %c0_14, %c0_15], %12 {strides = array<i32>} : memref<2x4x128xf32, #tpu.memory_space<vmem>>, vector<2x4x128xf32>,
    } else {
    }
    %c0 = arith.constant 0 : index
    %c0_1 = arith.constant 0 : index
    %c0_2 = arith.constant 0 : index
    %3 = vector.load %arg2[%c0, %c0_1, %c0_2] : memref<2x4x256xf32, #tpu.memory_space<vmem>>, vector<2x4x128xf32>
    %c0_3 = arith.constant 0 : index
    %c0_4 = arith.constant 0 : index
    %c128 = arith.constant 128 : index
    %4 = vector.load %arg2[%c0_3, %c0_4, %c128] : memref<2x4x256xf32, #tpu.memory_space<vmem>>, vector<2x4x128xf32>
    %5 = arith.addf %3, %4 : vector<2x4x128xf32>
    %c0_5 = arith.constant 0 : index
    %c0_6 = arith.constant 0 : index
    %c0_7 = arith.constant 0 : index
    %6 = vector.load %arg6[%c0_5, %c0_6, %c0_7] : memref<2x4x128xf32, #tpu.memory_space<vmem>>, vector<2x4x128xf32>
    %7 = arith.addf %6, %5 : vector<2x4x128xf32>
    %c0_8 = arith.constant 0 : index
    %c0_9 = arith.constant 0 : index
    %c0_10 = arith.constant 0 : index
    %8 = vector.load %arg6[%c0_8, %c0_9, %c0_10] : memref<2x4x128xf32, #tpu.memory_space<vmem>>, vector<2x4x128xf32>
    tpu.vector_store %arg6[%c0_8, %c0_9, %c0_10], %7 {strides = array<i32>} : memref<2x4x128xf32, #tpu.memory_space<vmem>>, vector<2x4x128xf32>,
    %c0_i32_11 = arith.constant 0 : i32
    %9 = arith.cmpi eq, %arg1, %c0_i32_11 : i32
    %10 = arith.extui %9 : i1 to i32
    %c0_i32_12 = arith.constant 0 : i32
    %11 = arith.cmpi ne, %10, %c0_i32_12 : i32
    scf.if %11 {
      %c0_13 = arith.constant 0 : index
      %c0_14 = arith.constant 0 : index
      %c0_15 = arith.constant 0 : index
      %12 = vector.load %arg6[%c0_13, %c0_14, %c0_15] : memref<2x4x128xf32, #tpu.memory_space<vmem>>, vector<2x4x128xf32>
      %cst = arith.constant dense<0.000000e+00> : vector<2x4xf32>
      %13 = vector.multi_reduction <add>, %12, %cst [2] : vector<2x4x128xf32> to vector<2x4xf32>
      %cst_16 = arith.constant 3.906250e-03 : f32
      %14 = vector.broadcast %cst_16 : f32 to vector<2x4xf32>
      %15 = arith.mulf %13, %14 : vector<2x4xf32>
      %c0_17 = arith.constant 0 : index
      %c0_18 = arith.constant 0 : index
      %16 = vector.load %arg3[%c0_17, %c0_18] : memref<4x8xf32, #tpu.memory_space<vmem>>, vector<4x8xf32>
      %cst_19 = arith.constant dense<0.000000e+00> : vector<2x8xf32>
      %17 = tpu.matmul %15, %16, %cst_19 {dimension_numbers = #tpu.dot_dimension_numbers<[1], [0], [0], [1], [0, 0, 1, 1], [], []>} : vector<2x4xf32>, vector<4x8xf32>, vector<2x8xf32> -> vector<2x8xf32>
      %c0_20 = arith.constant 0 : index
      %c0_21 = arith.constant 0 : index
      %18 = vector.load %arg4[%c0_20, %c0_21] : memref<1x8xf32, #tpu.memory_space<vmem>>, vector<1x8xf32>
      %19 = vector.broadcast %18 : vector<1x8xf32> to vector<2x8xf32>
      %20 = arith.addf %17, %19 : vector<2x8xf32>
      %c0_22 = arith.constant 0 : index
      %c0_23 = arith.constant 0 : index
      %21 = vector.load %arg5[%c0_22, %c0_23] : memref<2x8xf32, #tpu.memory_space<vmem>>, vector<2x8xf32>
      tpu.vector_store %arg5[%c0_22, %c0_23], %20 {strides = array<i32>} : memref<2x8xf32, #tpu.memory_space<vmem>>, vector<2x8xf32>,
    } else {
    }
    return
  }
  func.func @transform_0(%arg0: i32, %arg1: i32) -> (i32, i32, i32) {
    %c0_i32 = arith.constant 0 : i32
    %c0_i32_0 = arith.constant 0 : i32
    return %arg0, %c0_i32, %arg1 : i32, i32, i32
  }
  func.func @transform_1(%arg0: i32, %arg1: i32) -> (i32, i32) {
    %c0_i32 = arith.constant 0 : i32
    %c0_i32_0 = arith.constant 0 : i32
    %c0_i32_1 = arith.constant 0 : i32
    return %c0_i32, %c0_i32_0 : i32, i32
  }
  func.func @transform_2(%arg0: i32, %arg1: i32) -> (i32, i32) {
    %c0_i32 = arith.constant 0 : i32
    %c0_i32_0 = arith.constant 0 : i32
    %c0_i32_1 = arith.constant 0 : i32
    return %c0_i32, %c0_i32_0 : i32, i32
  }
  func.func @transform_3(%arg0: i32, %arg1: i32) -> (i32, i32) {
    %c0_i32 = arith.constant 0 : i32
    %c0_i32_0 = arith.constant 0 : i32
    return %arg0, %c0_i32 : i32, i32
  }
}

module attributes {stable_mosaic.version = 11 : i64} {
  func.func @_pool_head_kernel(%arg0: i32, %arg1: i32, %arg2: memref<2x4x256xf32, #tpu.memory_space<vmem>>, %arg3: memref<4x8xf32, #tpu.memory_space<vmem>>, %arg4: memref<1x8xf32, #tpu.memory_space<vmem>>, %arg5: memref<2x8xf32, #tpu.memory_space<vmem>>, %arg6: memref<2x4x128xf32, #tpu.memory_space<vmem>>) attributes {dimension_semantics = [#tpu.dimension_semantics<parallel>, #tpu.dimension_semantics<arbitrary>], iteration_bounds = array<i64: 1, 1>, scalar_prefetch = 0 : i64, scratch_operands = 1 : i64, tpu.core_type = #tpu.core_type<tc>, window_params = [{transform_indices = @transform_0, window_bounds = array<i64: 2, 4, 256>}, {pipeline_mode = #tpu.pipeline_mode<synchronous>, transform_indices = @transform_1, window_bounds = array<i64: 4, 8>}, {pipeline_mode = #tpu.pipeline_mode<synchronous>, transform_indices = @transform_2, window_bounds = array<i64: 1, 8>}, {transform_indices = @transform_3, window_bounds = array<i64: 2, 8>}]} {
    %c0_i32 = arith.constant 0 : i32
    %0 = arith.cmpi eq, %arg1, %c0_i32 : i32
    %1 = arith.extui %0 : i1 to i32
    %c0_i32_0 = arith.constant 0 : i32
    %2 = arith.cmpi ne, %1, %c0_i32_0 : i32
    scf.if %2 {
      %cst = arith.constant 0.000000e+00 : f32
      %12 = vector.broadcast %cst : f32 to vector<2x4x128xf32>
      %c0_13 = arith.constant 0 : index
      %c0_14 = arith.constant 0 : index
      %c0_15 = arith.constant 0 : index
      %13 = vector.load %arg6[%c0_13, %c0_14, %c0_15] : memref<2x4x128xf32, #tpu.memory_space<vmem>>, vector<2x4x128xf32>
      tpu.vector_store %arg6[%c0_13, %c0_14, %c0_15], %12 {strides = array<i32>} : memref<2x4x128xf32, #tpu.memory_space<vmem>>, vector<2x4x128xf32>,
    } else {
    }
    %c0 = arith.constant 0 : index
    %c0_1 = arith.constant 0 : index
    %c0_2 = arith.constant 0 : index
    %3 = vector.load %arg2[%c0, %c0_1, %c0_2] : memref<2x4x256xf32, #tpu.memory_space<vmem>>, vector<2x4x128xf32>
    %c0_3 = arith.constant 0 : index
    %c0_4 = arith.constant 0 : index
    %c128 = arith.constant 128 : index
    %4 = vector.load %arg2[%c0_3, %c0_4, %c128] : memref<2x4x256xf32, #tpu.memory_space<vmem>>, vector<2x4x128xf32>
    %5 = arith.addf %3, %4 : vector<2x4x128xf32>
    %c0_5 = arith.constant 0 : index
    %c0_6 = arith.constant 0 : index
    %c0_7 = arith.constant 0 : index
    %6 = vector.load %arg6[%c0_5, %c0_6, %c0_7] : memref<2x4x128xf32, #tpu.memory_space<vmem>>, vector<2x4x128xf32>
    %7 = arith.addf %6, %5 : vector<2x4x128xf32>
    %c0_8 = arith.constant 0 : index
    %c0_9 = arith.constant 0 : index
    %c0_10 = arith.constant 0 : index
    %8 = vector.load %arg6[%c0_8, %c0_9, %c0_10] : memref<2x4x128xf32, #tpu.memory_space<vmem>>, vector<2x4x128xf32>
    tpu.vector_store %arg6[%c0_8, %c0_9, %c0_10], %7 {strides = array<i32>} : memref<2x4x128xf32, #tpu.memory_space<vmem>>, vector<2x4x128xf32>,
    %c0_i32_11 = arith.constant 0 : i32
    %9 = arith.cmpi eq, %arg1, %c0_i32_11 : i32
    %10 = arith.extui %9 : i1 to i32
    %c0_i32_12 = arith.constant 0 : i32
    %11 = arith.cmpi ne, %10, %c0_i32_12 : i32
    scf.if %11 {
      %c0_13 = arith.constant 0 : index
      %c0_14 = arith.constant 0 : index
      %c0_15 = arith.constant 0 : index
      %12 = vector.load %arg6[%c0_13, %c0_14, %c0_15] : memref<2x4x128xf32, #tpu.memory_space<vmem>>, vector<2x4x128xf32>
      %cst = arith.constant dense<0.000000e+00> : vector<2x4xf32>
      %13 = vector.multi_reduction <add>, %12, %cst [2] : vector<2x4x128xf32> to vector<2x4xf32>
      %cst_16 = arith.constant 3.906250e-03 : f32
      %14 = vector.broadcast %cst_16 : f32 to vector<2x4xf32>
      %15 = arith.mulf %13, %14 : vector<2x4xf32>
      %c0_17 = arith.constant 0 : index
      %c0_18 = arith.constant 0 : index
      %16 = vector.load %arg3[%c0_17, %c0_18] : memref<4x8xf32, #tpu.memory_space<vmem>>, vector<4x8xf32>
      %cst_19 = arith.constant dense<0.000000e+00> : vector<2x8xf32>
      %17 = tpu.matmul %15, %16, %cst_19 {dimension_numbers = #tpu.dot_dimension_numbers<[1], [0], [0], [1], [0, 0, 1, 1], [], []>} : vector<2x4xf32>, vector<4x8xf32>, vector<2x8xf32> -> vector<2x8xf32>
      %c0_20 = arith.constant 0 : index
      %c0_21 = arith.constant 0 : index
      %18 = vector.load %arg4[%c0_20, %c0_21] : memref<1x8xf32, #tpu.memory_space<vmem>>, vector<1x8xf32>
      %19 = vector.broadcast %18 : vector<1x8xf32> to vector<2x8xf32>
      %20 = arith.addf %17, %19 : vector<2x8xf32>
      %c0_22 = arith.constant 0 : index
      %c0_23 = arith.constant 0 : index
      %21 = vector.load %arg5[%c0_22, %c0_23] : memref<2x8xf32, #tpu.memory_space<vmem>>, vector<2x8xf32>
      tpu.vector_store %arg5[%c0_22, %c0_23], %20 {strides = array<i32>} : memref<2x8xf32, #tpu.memory_space<vmem>>, vector<2x8xf32>,
    } else {
    }
    return
  }
  func.func @transform_0(%arg0: i32, %arg1: i32) -> (i32, i32, i32) {
    %c0_i32 = arith.constant 0 : i32
    %c0_i32_0 = arith.constant 0 : i32
    return %arg0, %c0_i32, %arg1 : i32, i32, i32
  }
  func.func @transform_1(%arg0: i32, %arg1: i32) -> (i32, i32) {
    %c0_i32 = arith.constant 0 : i32
    %c0_i32_0 = arith.constant 0 : i32
    %c0_i32_1 = arith.constant 0 : i32
    return %c0_i32, %c0_i32_0 : i32, i32
  }
  func.func @transform_2(%arg0: i32, %arg1: i32) -> (i32, i32) {
    %c0_i32 = arith.constant 0 : i32
    %c0_i32_0 = arith.constant 0 : i32
    %c0_i32_1 = arith.constant 0 : i32
    return %c0_i32, %c0_i32_0 : i32, i32
  }
  func.func @transform_3(%arg0: i32, %arg1: i32) -> (i32, i32) {
    %c0_i32 = arith.constant 0 : i32
    %c0_i32_0 = arith.constant 0 : i32
    return %arg0, %c0_i32 : i32, i32
  }
}

</mosaic_0001>

<bundles_post_ra>
// kernel: tpu_custom_call.1
= control target key start
LH: loop header
LB: loop body
LE: loop exit
PB: predicated region body
PF: predicated region fallthrough
CT: control target
= control target key end

     0   :  { %8 = vsyncpa [#allocation4], 0  ;;  %s261_s0 = inlined_call_operand.hbm [shape: f32[2,4,256], index: 0, kind: input, shape index: {}]   ;;  %s262_s1 = inlined_call_operand.hbm [shape: f32[4,8], index: 1, kind: input, shape index: {}]   ;;  %s263_s2 = inlined_call_operand.vmem [shape: f32[1,8], index: 2, kind: input, shape index: {}]   ;;  %s264_s3 = inlined_call_operand.hbm [shape: f32[2,8], index: 3, kind: output, shape index: {}]  }
   0x1   :  { %9 = vsyncpa [#allocation7], 0 }
   0x2   :  { %10 = vsyncpa [#allocation5], 0  ;;  %s15_s14 = sshll.u32 %s261_s0, 4  ;;  %s223_s15 = smov [#allocation3]   ;;  %s16_s14 = int_to_ptr.hbm [resolvable:$true] %s15_s14 }
   0x3   :  { %s17_s16 = sshll.u32 %s223_s15, 4  ;;  %s29_s19 = sshll.u32 %s262_s1, 4  ;;  %s18_s16 = int_to_ptr.vmem [resolvable:$true] %s17_s16  ;;  %s30_s19 = int_to_ptr.hbm [resolvable:$true] %s29_s19 }
   0x4   :  { %s224_s20 = smov 128   ;;  %s225_s21 = smov 8  }
   0x5   :  { %23 = dma.hbm_to_vmem [thread:$0]  %s16_s14, 256, %s18_s16, [#allocation4], %s224_s20, %s224_s20, %s225_s21  }
   0x6   :  { %s226_s22 = smov [#allocation6]  }
   0x7   :  { %s31_s23 = sshll.u32 %s226_s22, 4  ;;  %s32_s23 = int_to_ptr.vmem [resolvable:$true] %s31_s23 }
   0x8   :  { %34 = dma.hbm_to_vmem [thread:$0]  %s30_s19, 64, %s32_s23, [#allocation7]  }
   0x9   :  { %217 = dma.done.wait [#allocation4], 256  }
   0xa   :  { %218 = vsyncadd [#allocation4], 4294967040 }
   0xb   :  { %219 = dma.done.wait [#allocation7], 64  }
   0xc   :  { %220 = vsyncadd [#allocation7], 4294967232  ;;  %v227_v0 = vmov 0.0   ;;  %v51_v1 = vld [vmem:[#allocation3] sm:$0xf]  ;;  %vm68_vm0 = vcmask 1043456   ;;  %v84_v17 = vlaneseq }
   0xd   :  { %49 = vst [vmem:[#allocation2] sm:$0xf] %v227_v0  ;;  %v53_v2 = vld [vmem:[#allocation3 + $0x4] sm:$0xf]  ;;  %v52_v3 = vld [vmem:[#allocation3 + $0x8] sm:$0xf] }
   0xe   :  { %50 = vst [vmem:[#allocation2 + $0x4] sm:$0xf] %v227_v0  ;;  %v55_v4 = vadd.f32 %v53_v2, %v51_v1  ;;  %v54_v6 = vld [vmem:[#allocation3 + $0xc] sm:$0xf]  ;;  %v77_v15 = vld [vmem:[#allocation6] sm:$0xf] }
   0xf   :  { %v56_v7 = vadd.f32 %v54_v6, %v52_v3  ;;  %136 = vmatpush.msk.msra.mxu0 %vm68_vm0, %v77_v15  ;;  %v85_v18 = vand.u32 127, %v84_v17  ;;  %vm88_vm1 = vcmask 1041409   ;;  %vm90_vm2 = vcmask 31744   ;;  %v144_v25 = vld [vmem:[%s263_s2] ss:$0 sm:$0xff]  ;;  %s228_s24 = smov [#allocation8]  }
  0x10   :  { %s123_s25 = sshll.u32 %s228_s24, 4  ;;  %s125_s28 = sshll.u32 %s264_s3, 4  ;;  %vm116_vm3 = vcmask 58368   ;;  %s124_s25 = int_to_ptr.vmem [resolvable:$true] %s123_s25  ;;  %s126_s28 = int_to_ptr.hbm [resolvable:$true] %s125_s28 }
  0x14   :  { %v57_v5 = vld [vmem:[#allocation2] sm:$0xf] }
  0x15   :  { %v58_v8 = vld [vmem:[#allocation2 + $0x4] sm:$0xf]  ;;  %v59_v9 = vadd.f32 %v57_v5, %v55_v4 }
  0x16   :  { %v60_v10 = vadd.f32 %v58_v8, %v56_v7 }
  0x17   :  { %61 = vst [vmem:[#allocation2] sm:$0xf] %v59_v9 }
  0x18   :  { %62 = vst [vmem:[#allocation2 + $0x4] sm:$0xf] %v60_v10 }
  0x1e   :  { %v66_v11 = vld [vmem:[#allocation2] sm:$0xf] }
  0x1f   :  { %v69_v12 = vsel %vm68_vm0, %v66_v11, 0.0  ;;  %v67_v13 = vld [vmem:[#allocation2 + $0x4] sm:$0xf] }
  0x20   :  { %70 = vadd.xlane.f32.xlu0 %v69_v12  ;;  %v72_v14 = vsel %vm68_vm0, %v67_v13, 0.0 }
  0x28   :  { %73 = vadd.xlane.f32.xlu0 %v72_v14 }
  0x93   :  { %v71_v16 = vpop.xlane.xlu0 %70 }
  0x94   :  { %v75_v19 = vmul.f32 0.00390625, %v71_v16 }
  0x96   :  { %v86_v22 = vperm.slane %v75_v19, %v85_v18 }
  0x9b   :  { %v74_v20 = vpop.xlane.xlu0 %73 }
  0x9c   :  { %v76_v21 = vmul.f32 0.00390625, %v74_v20 }
  0x9e   :  { %v87_v23 = vperm.slane %v76_v21, %v85_v18 }
  0xa0   :  { %v89_v24 = vsel %vm88_vm1, %v87_v23, %v86_v22 }
  0xa1   :  { %137 = vmatmul.msk.f32.vlgmr.msra.gmra.mxu0 %vm90_vm2, %v89_v24 }
 0x11e   :  { %v113_v26 = vpop.f32.mrf.mxu0 }
 0x11f   :  { %v114_v27 = vadd.f32 %v144_v25, %v113_v26 }
 0x121   :  { %117 = vst.msk [vmem:[#allocation8] sm:$0x3] %vm116_vm3, %v114_v27 }
 0x122   :  { %128 = dma.vmem_to_hbm [thread:$0]  %s124_s25, 32, %s126_s28, [#allocation5]  }
 0x123   :  { %221 = dma.done.wait [#allocation5], 32  }
 0x124   :  { %222 = vsyncadd [#allocation5], 4294967264 }
 0x125   :  { %133 = vsyncpa [#allocation4], 1 }
 0x126   :  { %134 = vsyncpa [#allocation7], 1 }
 0x127   :  { %135 = vsyncpa [#allocation5], 1 }

// kernel: tpu_custom_call.1
= control target key start
LH: loop header
LB: loop body
LE: loop exit
PB: predicated region body
PF: predicated region fallthrough
CT: control target
= control target key end

     0   :  { %8 = vsyncpa [#allocation4], 0  ;;  %s261_s0 = inlined_call_operand.hbm [shape: f32[2,4,256], index: 0, kind: input, shape index: {}]   ;;  %s262_s1 = inlined_call_operand.hbm [shape: f32[4,8], index: 1, kind: input, shape index: {}]   ;;  %s263_s2 = inlined_call_operand.vmem [shape: f32[1,8], index: 2, kind: input, shape index: {}]   ;;  %s264_s3 = inlined_call_operand.hbm [shape: f32[2,8], index: 3, kind: output, shape index: {}]  }
   0x1   :  { %9 = vsyncpa [#allocation7], 0 }
   0x2   :  { %10 = vsyncpa [#allocation5], 0  ;;  %s15_s14 = sshll.u32 %s261_s0, 4  ;;  %s223_s15 = smov [#allocation3]   ;;  %s16_s14 = int_to_ptr.hbm [resolvable:$true] %s15_s14 }
   0x3   :  { %s17_s16 = sshll.u32 %s223_s15, 4  ;;  %s29_s19 = sshll.u32 %s262_s1, 4  ;;  %s18_s16 = int_to_ptr.vmem [resolvable:$true] %s17_s16  ;;  %s30_s19 = int_to_ptr.hbm [resolvable:$true] %s29_s19 }
   0x4   :  { %s224_s20 = smov 128   ;;  %s225_s21 = smov 8  }
   0x5   :  { %23 = dma.hbm_to_vmem [thread:$0]  %s16_s14, 256, %s18_s16, [#allocation4], %s224_s20, %s224_s20, %s225_s21  }
   0x6   :  { %s226_s22 = smov [#allocation6]  }
   0x7   :  { %s31_s23 = sshll.u32 %s226_s22, 4  ;;  %s32_s23 = int_to_ptr.vmem [resolvable:$true] %s31_s23 }
   0x8   :  { %34 = dma.hbm_to_vmem [thread:$0]  %s30_s19, 64, %s32_s23, [#allocation7]  }
   0x9   :  { %217 = dma.done.wait [#allocation4], 256  }
   0xa   :  { %218 = vsyncadd [#allocation4], 4294967040 }
   0xb   :  { %219 = dma.done.wait [#allocation7], 64  }
   0xc   :  { %220 = vsyncadd [#allocation7], 4294967232  ;;  %v227_v0 = vmov 0.0   ;;  %v51_v1 = vld [vmem:[#allocation3] sm:$0xf]  ;;  %vm68_vm0 = vcmask 1043456   ;;  %v84_v17 = vlaneseq }
   0xd   :  { %49 = vst [vmem:[#allocation2] sm:$0xf] %v227_v0  ;;  %v53_v2 = vld [vmem:[#allocation3 + $0x4] sm:$0xf]  ;;  %v52_v3 = vld [vmem:[#allocation3 + $0x8] sm:$0xf] }
   0xe   :  { %50 = vst [vmem:[#allocation2 + $0x4] sm:$0xf] %v227_v0  ;;  %v55_v4 = vadd.f32 %v53_v2, %v51_v1  ;;  %v54_v6 = vld [vmem:[#allocation3 + $0xc] sm:$0xf]  ;;  %v77_v15 = vld [vmem:[#allocation6] sm:$0xf] }
   0xf   :  { %v56_v7 = vadd.f32 %v54_v6, %v52_v3  ;;  %136 = vmatpush.msk.msra.mxu0 %vm68_vm0, %v77_v15  ;;  %v85_v18 = vand.u32 127, %v84_v17  ;;  %vm88_vm1 = vcmask 1041409   ;;  %vm90_vm2 = vcmask 31744   ;;  %v144_v25 = vld [vmem:[%s263_s2] ss:$0 sm:$0xff]  ;;  %s228_s24 = smov [#allocation8]  }
  0x10   :  { %s123_s25 = sshll.u32 %s228_s24, 4  ;;  %s125_s28 = sshll.u32 %s264_s3, 4  ;;  %vm116_vm3 = vcmask 58368   ;;  %s124_s25 = int_to_ptr.vmem [resolvable:$true] %s123_s25  ;;  %s126_s28 = int_to_ptr.hbm [resolvable:$true] %s125_s28 }
  0x14   :  { %v57_v5 = vld [vmem:[#allocation2] sm:$0xf] }
  0x15   :  { %v58_v8 = vld [vmem:[#allocation2 + $0x4] sm:$0xf]  ;;  %v59_v9 = vadd.f32 %v57_v5, %v55_v4 }
  0x16   :  { %v60_v10 = vadd.f32 %v58_v8, %v56_v7 }
  0x17   :  { %61 = vst [vmem:[#allocation2] sm:$0xf] %v59_v9 }
  0x18   :  { %62 = vst [vmem:[#allocation2 + $0x4] sm:$0xf] %v60_v10 }
  0x1e   :  { %v66_v11 = vld [vmem:[#allocation2] sm:$0xf] }
  0x1f   :  { %v69_v12 = vsel %vm68_vm0, %v66_v11, 0.0  ;;  %v67_v13 = vld [vmem:[#allocation2 + $0x4] sm:$0xf] }
  0x20   :  { %70 = vadd.xlane.f32.xlu0 %v69_v12  ;;  %v72_v14 = vsel %vm68_vm0, %v67_v13, 0.0 }
  0x28   :  { %73 = vadd.xlane.f32.xlu0 %v72_v14 }
  0x93   :  { %v71_v16 = vpop.xlane.xlu0 %70 }
  0x94   :  { %v75_v19 = vmul.f32 0.00390625, %v71_v16 }
  0x96   :  { %v86_v22 = vperm.slane %v75_v19, %v85_v18 }
  0x9b   :  { %v74_v20 = vpop.xlane.xlu0 %73 }
  0x9c   :  { %v76_v21 = vmul.f32 0.00390625, %v74_v20 }
  0x9e   :  { %v87_v23 = vperm.slane %v76_v21, %v85_v18 }
  0xa0   :  { %v89_v24 = vsel %vm88_vm1, %v87_v23, %v86_v22 }
  0xa1   :  { %137 = vmatmul.msk.f32.vlgmr.msra.gmra.mxu0 %vm90_vm2, %v89_v24 }
 0x11e   :  { %v113_v26 = vpop.f32.mrf.mxu0 }
 0x11f   :  { %v114_v27 = vadd.f32 %v144_v25, %v113_v26 }
 0x121   :  { %117 = vst.msk [vmem:[#allocation8] sm:$0x3] %vm116_vm3, %v114_v27 }
 0x122   :  { %128 = dma.vmem_to_hbm [thread:$0]  %s124_s25, 32, %s126_s28, [#allocation5]  }
 0x123   :  { %221 = dma.done.wait [#allocation5], 32  }
 0x124   :  { %222 = vsyncadd [#allocation5], 4294967264 }
 0x125   :  { %133 = vsyncpa [#allocation4], 1 }
 0x126   :  { %134 = vsyncpa [#allocation7], 1 }
 0x127   :  { %135 = vsyncpa [#allocation5], 1 }

</bundles_post_ra>
